<compile_context>
chip_gen: v5e
topology: v5e:2x2
jax: 0.10.0
libtpu: 0.0.40
codegen_flags: <defaults>
</compile_context>

<pallas_src>
import math
from functools import partial

import jax
import jax.numpy as jnp
from jax.experimental import pallas as pl
from jax.experimental.pallas import tpu as pltpu


def _round_up(x, m):
    return (x + m - 1) // m * m


# ----------------------------------------------------------------------------
# Fused decoder kernel: one row-tile in, all layers applied in VMEM/vregs.
# ----------------------------------------------------------------------------
def _decoder_kernel(x_ref, w_ref, b_ref, o_ref, *, num_layers, k0, out_dim):
    # x_ref: (tm, k0) activations, w_ref: (L, Dp, Dp), b_ref: (L, 1, Dp),
    # o_ref: (tm, out_dim).
    h = x_ref[...]                                     # (tm, k0) f32
    # Layer 0: contract only over the real (8-aligned) input width k0.
    h = jnp.dot(h, w_ref[0, :k0, :], preferred_element_type=jnp.float32) + b_ref[0]
    h = jnp.maximum(h, 0.0)                            # ReLU after every layer
    for l in range(1, num_layers):                     # static unroll (layer is small)
        h = jnp.dot(h, w_ref[l], preferred_element_type=jnp.float32) + b_ref[l]
        h = jnp.maximum(h, 0.0)
    o_ref[...] = h[:, :out_dim]                        # narrow (tm, out_dim) store


# ----------------------------------------------------------------------------
# Parameter construction (PyTorch nn.Linear-style uniform init), and packing
# into a single lane-dense weight slab.
# ----------------------------------------------------------------------------
def init_decoder(key, input_dim, hidden_dim, out_dim, layer):
    dims = []
    for i in range(layer):
        if layer > 1:
            if i == 0:
                dims.append((input_dim, hidden_dim))
            elif i == layer - 1:
                dims.append((hidden_dim, out_dim))
            else:
                dims.append((hidden_dim, hidden_dim))
        else:
            dims.append((input_dim, out_dim))
    keys = jax.random.split(key, layer)
    params = []
    for i, (din, dout) in enumerate(dims):
        kw, kb = jax.random.split(keys[i])
        bound = 1.0 / math.sqrt(din)
        w = jax.random.uniform(kw, (din, dout), jnp.float32, -bound, bound)
        b = jax.random.uniform(kb, (dout,), jnp.float32, -bound, bound)
        params.append((w, b))
    return params


def pack_decoder_params(params, input_dim):
    """Zero-pad every layer into one (L, Dmax, Dmax) / (L, 1, Dmax) slab.

    Padded weight rows/cols and bias lanes are zero, so padded lanes of the
    hidden activations stay exactly zero through relu(h @ W + b).
    """
    L = len(params)
    dims = [input_dim] + [w.shape[1] for w, _ in params]
    d_pad = _round_up(max(dims), 128)
    ws = jnp.zeros((L, d_pad, d_pad), jnp.float32)
    bs = jnp.zeros((L, 1, d_pad), jnp.float32)
    for l, (w, b) in enumerate(params):
        ws = ws.at[l, : w.shape[0], : w.shape[1]].set(w)
        bs = bs.at[l, 0, : b.shape[0]].set(b)
    return ws, bs


# ----------------------------------------------------------------------------
# Forward wrapper: feed H directly, tile rows, write exactly (N, out_dim).
# ----------------------------------------------------------------------------
def decoder_forward(ws, bs, H, out_dim, *, block_rows=1024):
    N, din = H.shape
    L, d_pad, _ = ws.shape

    # Only pad input columns up to the sublane quantum (8); usually a no-op
    # (din=48 already 8-aligned).  The padded weight rows are zero, so this
    # is exact.
    k0 = _round_up(din, 8)
    if k0 != din:
        H = jnp.pad(H, ((0, 0), (0, k0 - din)))

    # Row tile: large enough to amortise the ~0.35us per-grid-step overhead,
    # but keep >= 2 grid steps when N is small so both v7x TensorCores get
    # work under the "parallel" annotation.
    n8 = _round_up(N, 8)
    if n8 > block_rows:
        tm = block_rows
    else:
        tm = max(8, _round_up(pl.cdiv(n8, 2), 8))
    grid_rows = pl.cdiv(N, tm)

    out = pl.pallas_call(
        partial(_decoder_kernel, num_layers=L, k0=k0, out_dim=out_dim),
        out_shape=jax.ShapeDtypeStruct((N, out_dim), jnp.float32),
        grid=(grid_rows,),
        in_specs=[
            pl.BlockSpec((tm, k0), lambda i: (i, 0)),              # activations (no HBM pad pass)
            pl.BlockSpec((L, d_pad, d_pad), lambda i: (0, 0, 0)),  # all weights (resident)
            pl.BlockSpec((L, 1, d_pad), lambda i: (0, 0, 0)),      # all biases  (resident)
        ],
        out_specs=pl.BlockSpec((tm, out_dim), lambda i: (i, 0)),   # exact-size output
        compiler_params=pltpu.CompilerParams(
            dimension_semantics=("parallel",)),                    # megacore on v7x
    )(H, ws, bs)

    return out


if __name__ == "__main__":
    key = jax.random.PRNGKey(0)
    kp, kx, kp1, kx2 = jax.random.split(key, 4)

    # --- multi-layer decoder (layer > 1 branch), small batch ------------------
    input_dim, hidden_dim, out_dim, layer = 48, 32, 8, 3
    N = 16

    params = init_decoder(kp, input_dim, hidden_dim, out_dim, layer)
    ws, bs = pack_decoder_params(params, input_dim)
    H = jax.random.normal(kx, (N, input_dim), dtype=jnp.float32)

    fwd = jax.jit(lambda ws_, bs_, h_: decoder_forward(ws_, bs_, h_, out_dim))
    out = fwd(ws, bs, H)
    jax.block_until_ready(out)

    ref = H
    for w, b in params:
        ref = jnp.maximum(ref @ w + b, 0.0)
    assert out.shape == (N, out_dim)
    assert jnp.allclose(out, ref, atol=1e-4, rtol=1e-4), float(jnp.max(jnp.abs(out - ref)))

    # --- ragged row count (N not a multiple of the tile) ----------------------
    N2 = 300
    H2 = jax.random.normal(kx2, (N2, input_dim), dtype=jnp.float32)
    out2 = jax.jit(lambda ws_, bs_, h_: decoder_forward(ws_, bs_, h_, out_dim))(ws, bs, H2)
    jax.block_until_ready(out2)
    ref2 = H2
    for w, b in params:
        ref2 = jnp.maximum(ref2 @ w + b, 0.0)
    assert out2.shape == (N2, out_dim)
    assert jnp.allclose(out2, ref2, atol=1e-4, rtol=1e-4), float(jnp.max(jnp.abs(out2 - ref2)))

    # --- single-layer decoder (layer == 1 branch) -----------------------------
    params1 = init_decoder(kp1, input_dim, hidden_dim, 4, 1)
    ws1, bs1 = pack_decoder_params(params1, input_dim)
    fwd1 = jax.jit(lambda ws_, bs_, h_: decoder_forward(ws_, bs_, h_, 4))
    out1 = fwd1(ws1, bs1, H)
    jax.block_until_ready(out1)

    ref1 = jnp.maximum(H @ params1[0][0] + params1[0][1], 0.0)
    assert out1.shape == (N, 4)
    assert jnp.allclose(out1, ref1, atol=1e-4, rtol=1e-4)

    print("KERNEL_OK")
</pallas_src>

<mosaic_0001>
module attributes {stable_mosaic.version = 11 : i64} {
  func.func @_decoder_kernel(%arg0: i32, %arg1: memref<8x48xf32, #tpu.memory_space<vmem>>, %arg2: memref<3x128x128xf32, #tpu.memory_space<vmem>>, %arg3: memref<3x1x128xf32, #tpu.memory_space<vmem>>, %arg4: memref<8x8xf32, #tpu.memory_space<vmem>>) attributes {dimension_semantics = [#tpu.dimension_semantics<parallel>], iteration_bounds = array<i64: 2>, scalar_prefetch = 0 : i64, scratch_operands = 0 : i64, tpu.core_type = #tpu.core_type<tc>, window_params = [{transform_indices = @transform_0, window_bounds = array<i64: 8, 48>}, {pipeline_mode = #tpu.pipeline_mode<synchronous>, transform_indices = @transform_1, window_bounds = array<i64: 3, 128, 128>}, {pipeline_mode = #tpu.pipeline_mode<synchronous>, transform_indices = @transform_2, window_bounds = array<i64: 3, 1, 128>}, {transform_indices = @transform_3, window_bounds = array<i64: 8, 8>}]} {
    %c0 = arith.constant 0 : index
    %c0_0 = arith.constant 0 : index
    %0 = vector.load %arg1[%c0, %c0_0] : memref<8x48xf32, #tpu.memory_space<vmem>>, vector<8x48xf32>
    %c0_1 = arith.constant 0 : index
    %c0_2 = arith.constant 0 : index
    %c0_3 = arith.constant 0 : index
    %1 = vector.load %arg2[%c0_1, %c0_2, %c0_3] : memref<3x128x128xf32, #tpu.memory_space<vmem>>, vector<1x48x128xf32>
    %2 = vector.shape_cast %1 : vector<1x48x128xf32> to vector<48x128xf32>
    %cst = arith.constant dense<0.000000e+00> : vector<8x128xf32>
    %3 = tpu.matmul %0, %2, %cst {dimension_numbers = #tpu.dot_dimension_numbers<[1], [0], [0], [1], [0, 0, 1, 1], [], []>} : vector<8x48xf32>, vector<48x128xf32>, vector<8x128xf32> -> vector<8x128xf32>
    %c0_4 = arith.constant 0 : index
    %c0_5 = arith.constant 0 : index
    %c0_6 = arith.constant 0 : index
    %4 = vector.load %arg3[%c0_4, %c0_5, %c0_6] : memref<3x1x128xf32, #tpu.memory_space<vmem>>, vector<1x1x128xf32>
    %5 = vector.shape_cast %4 : vector<1x1x128xf32> to vector<1x128xf32>
    %6 = vector.broadcast %5 : vector<1x128xf32> to vector<8x128xf32>
    %7 = arith.addf %3, %6 : vector<8x128xf32>
    %cst_7 = arith.constant 0.000000e+00 : f32
    %8 = vector.broadcast %cst_7 : f32 to vector<8x128xf32>
    %9 = arith.maximumf %7, %8 : vector<8x128xf32>
    %c1 = arith.constant 1 : index
    %c0_8 = arith.constant 0 : index
    %c0_9 = arith.constant 0 : index
    %10 = vector.load %arg2[%c1, %c0_8, %c0_9] : memref<3x128x128xf32, #tpu.memory_space<vmem>>, vector<1x128x128xf32>
    %11 = vector.shape_cast %10 : vector<1x128x128xf32> to vector<128x128xf32>
    %cst_10 = arith.constant dense<0.000000e+00> : vector<8x128xf32>
    %12 = tpu.matmul %9, %11, %cst_10 {dimension_numbers = #tpu.dot_dimension_numbers<[1], [0], [0], [1], [0, 0, 1, 1], [], []>} : vector<8x128xf32>, vector<128x128xf32>, vector<8x128xf32> -> vector<8x128xf32>
    %c1_11 = arith.constant 1 : index
    %c0_12 = arith.constant 0 : index
    %c0_13 = arith.constant 0 : index
    %13 = vector.load %arg3[%c1_11, %c0_12, %c0_13] : memref<3x1x128xf32, #tpu.memory_space<vmem>>, vector<1x1x128xf32>
    %14 = vector.shape_cast %13 : vector<1x1x128xf32> to vector<1x128xf32>
    %15 = vector.broadcast %14 : vector<1x128xf32> to vector<8x128xf32>
    %16 = arith.addf %12, %15 : vector<8x128xf32>
    %cst_14 = arith.constant 0.000000e+00 : f32
    %17 = vector.broadcast %cst_14 : f32 to vector<8x128xf32>
    %18 = arith.maximumf %16, %17 : vector<8x128xf32>
    %c2 = arith.constant 2 : index
    %c0_15 = arith.constant 0 : index
    %c0_16 = arith.constant 0 : index
    %19 = vector.load %arg2[%c2, %c0_15, %c0_16] : memref<3x128x128xf32, #tpu.memory_space<vmem>>, vector<1x128x128xf32>
    %20 = vector.shape_cast %19 : vector<1x128x128xf32> to vector<128x128xf32>
    %cst_17 = arith.constant dense<0.000000e+00> : vector<8x128xf32>
    %21 = tpu.matmul %18, %20, %cst_17 {dimension_numbers = #tpu.dot_dimension_numbers<[1], [0], [0], [1], [0, 0, 1, 1], [], []>} : vector<8x128xf32>, vector<128x128xf32>, vector<8x128xf32> -> vector<8x128xf32>
    %c2_18 = arith.constant 2 : index
    %c0_19 = arith.constant 0 : index
    %c0_20 = arith.constant 0 : index
    %22 = vector.load %arg3[%c2_18, %c0_19, %c0_20] : memref<3x1x128xf32, #tpu.memory_space<vmem>>, vector<1x1x128xf32>
    %23 = vector.shape_cast %22 : vector<1x1x128xf32> to vector<1x128xf32>
    %24 = vector.broadcast %23 : vector<1x128xf32> to vector<8x128xf32>
    %25 = arith.addf %21, %24 : vector<8x128xf32>
    %cst_21 = arith.constant 0.000000e+00 : f32
    %26 = vector.broadcast %cst_21 : f32 to vector<8x128xf32>
    %27 = arith.maximumf %25, %26 : vector<8x128xf32>
    %28 = vector.extract_strided_slice %27 {offsets = [0, 0], sizes = [8, 8], strides = [1, 1]} : vector<8x128xf32> to vector<8x8xf32>
    %c0_22 = arith.constant 0 : index
    %c0_23 = arith.constant 0 : index
    %29 = vector.load %arg4[%c0_22, %c0_23] : memref<8x8xf32, #tpu.memory_space<vmem>>, vector<8x8xf32>
    tpu.vector_store %arg4[%c0_22, %c0_23], %28 {strides = array<i32>} : memref<8x8xf32, #tpu.memory_space<vmem>>, vector<8x8xf32>,
    return
  }
  func.func @transform_0(%arg0: i32) -> (i32, i32) {
    %c0_i32 = arith.constant 0 : i32
    %c0_i32_0 = arith.constant 0 : i32
    return %arg0, %c0_i32 : i32, i32
  }
  func.func @transform_1(%arg0: i32) -> (i32, i32, i32) {
    %c0_i32 = arith.constant 0 : i32
    %c0_i32_0 = arith.constant 0 : i32
    %c0_i32_1 = arith.constant 0 : i32
    %c0_i32_2 = arith.constant 0 : i32
    return %c0_i32, %c0_i32_0, %c0_i32_1 : i32, i32, i32
  }
  func.func @transform_2(%arg0: i32) -> (i32, i32, i32) {
    %c0_i32 = arith.constant 0 : i32
    %c0_i32_0 = arith.constant 0 : i32
    %c0_i32_1 = arith.constant 0 : i32
    %c0_i32_2 = arith.constant 0 : i32
    return %c0_i32, %c0_i32_0, %c0_i32_1 : i32, i32, i32
  }
  func.func @transform_3(%arg0: i32) -> (i32, i32) {
    %c0_i32 = arith.constant 0 : i32
    %c0_i32_0 = arith.constant 0 : i32
    return %arg0, %c0_i32 : i32, i32
  }
}

</mosaic_0001>

<bundles_post_ra>
// kernel: _lambda_.1
= control target key start
LH: loop header
LB: loop body
LE: loop exit
PB: predicated region body
PF: predicated region fallthrough
CT: control target
= control target key end

     0   :  { %8 = vsyncpa [#allocation3], 0  ;;  %s776_s0 = inlined_call_operand.hbm [shape: f32[16,48], index: 0, kind: input, shape index: {}]   ;;  %s777_s1 = inlined_call_operand.hbm [shape: f32[3,128,128], index: 1, kind: input, shape index: {}]   ;;  %s778_s2 = inlined_call_operand.hbm [shape: f32[3,1,128], index: 2, kind: input, shape index: {}]   ;;  %s779_s3 = inlined_call_operand.vmem [shape: f32[16,8], index: 3, kind: output, shape index: {}]  }
   0x1   :  { %10 = vsyncpa [#allocation3 + $0x1], 0 }
   0x2   :  { %11 = vsyncpa [#allocation5], 0  ;;  %s667_s12 = smov 0   ;;  %s669_s13 = smov 0  }
   0x3   :  { %s671_s14 = smov 0   ;;  %s673_s15 = smov 0  }
   0x4 LB: > { %s127_s18 = sshll.u32 %s777_s1, 4  ;;  %s691_s19 = sadd.s32 4294967295, %s639_s15   ;;  %s639_s15 = sphi %s673_s15, %s786_s15   ;;  %s635_s14 = sphi %s671_s14, %s785_s14   ;;  %s631_s13 = sphi %s669_s13, %s784_s13   ;;  %s627_s12 = sphi %s667_s12, %s783_s12   ;;  %s128_s18 = int_to_ptr.hbm [resolvable:$true] %s127_s18 }
   0x5   : > { %p430_p0 = scmp.ge.s32.totalorder %s639_s15, 1  ;;  %p38_p1 = scmp.eq.s32.totalorder %s691_s19, 0 }
   0x6   : > { %p116_p2 = scmp.lt.s32.totalorder %s639_s15, 3  ;;  %s641_s21 = smov [#allocation4]  }
   0x7   : > { %s129_s22 = sshll.u32 %s641_s21, 4  ;;  %s141_s25 = sshll.u32 %s778_s2, 4  ;;  %s130_s22 = int_to_ptr.vmem [resolvable:$true] %s129_s22  ;;  %s142_s25 = int_to_ptr.hbm [resolvable:$true] %s141_s25 }
   0x8   : > { %p696_p3 = pnand %p430_p0, %p116_p2  ;;  %s642_s26 = smov [#allocation6]  }
   0x9   : > { %s143_s27 = sshll.u32 %s642_s26, 4  ;;  %s643_s28 = smov 128   ;;  %s144_s27 = int_to_ptr.vmem [resolvable:$true] %s143_s27 }
   0xa   : > { %p454_p4 = pneg %p696_p3  ;;  %s644_s29 = smov 8  }
   0xb   : > { %s645_s30 = smov 16   ;;  %s646_s4 = smov 1  }
   0xc   : > { %p455_p5 = pnand %p454_p4, %p38_p1  ;;  %s708_s5 = sadd.s32 1, %s639_s15  }
   0xd   : > { %s21_s6 = ssub.s32 %s639_s15, %s708_s5  ;;  %s24_s7 = sadd.s32 1, %s635_s14 }
   0xe   : > { %457 = dma.hbm_to_vmem [thread:$0]  (!%p455_p5), %s128_s18, 6144, %s130_s22, [#allocation5], %s643_s28, %s643_s28, %s644_s29  }
   0xf   : > { %460 = dma.hbm_to_vmem [thread:$0]  (!%p455_p5), %s142_s25, 48, %s144_s27, [#allocation5], %s645_s30, %s645_s30, %s646_s4  }
  0x10   : > { %p22_p6 = scmp.eq.s32.totalorder %s21_s6, 0  ;;  %p31_p7 = scmp.ne.s32.totalorder %s635_s14, %s631_s13 }
  0x11   : > { %p32_p8 = scmp.eq.s32.totalorder %s639_s15, 0  ;;  %p37_p9 = scmp.ne.s32.totalorder %s631_s13, %s627_s12 }
  0x12   : > { %s719_s8 = scalar_select %p22_p6, %s635_s14, %s24_s7  }
  0x13   : > { %p723_p10 = por %p38_p1, %p37_p9  ;;  %p467_p11 = scmp.lt.s32.totalorder %s639_s15, 2 }
  0x14   : > { %s157_s10 = sand.u32 1, %s635_s14   ;;  %s435_s11 = sshll.u32 %s639_s15, 3 }
  0x15   : > { %p33_p12 = por %p32_p8, %p31_p7  ;;  %s434_s16 = sshll.u32 %s157_s10, 3 }
  0x16   : > { %s165_s21 = scalar_lea.hbm %s776_s0, %s435_s11  ;;  %s161_s23 = scalar_lea.vmem [#allocation2], %s434_s16 }
  0x17   : > { %s167_s22 = sshll.u32 %s165_s21, 4  ;;  %s169_s24 = sshll.u32 %s161_s23, 4  ;;  %s168_s22 = int_to_ptr.hbm [resolvable:$true] %s167_s22  ;;  %s170_s24 = int_to_ptr.vmem [resolvable:$true] %s169_s24 }
  0x18   : > { %p733_p13 = pnand %p467_p11, %p33_p12  ;;  %s158_s25 = scalar_lea.sflag [#allocation3], %s157_s10 }
  0x19   : > { %s571_s26 = sshra.s32 %s168_s22, 4  ;;  %s578_s29 = scalar_lea.hbm %s776_s0, 16  ;;  %s572_s26 = int_to_ptr.hbm [resolvable:$true] %s571_s26 }
  0x1a   : > { %s573_s15 = scalar_lea.hbm %s572_s26, 8  ;;  %p575_p2 = pneg %p733_p13 }
  0x1b   : > { %p574_p0 = scmp.ne.s32.totalorder %s572_s26, %s573_s15  ;;  %p579_p6 = scmp.lt.s32.totalorder %s572_s26, %s776_s0 }
  0x1c   : > { %p580_p7 = scmp.lt.s32.totalorder %s578_s29, %s573_s15 }
  0x1d   : > { %p576_p4 = pnand %p575_p2, %p574_p0 }
  0x1e   : > { %p581_p8 = por %p580_p7, %p579_p6 }
  0x1f   : > { %p577_p5 = pneg %p576_p4 }
  0x21   : > { %p582_p9 = pnand %p581_p8, %p577_p5 }
  0x23   : > { %585 = shalt.err (!%p582_p9)
}
  0x24   : > { %464 = dma.hbm_to_vmem [thread:$0]  (!%p733_p13), %s168_s22, 128, %s170_s24, %s158_s25  }
  0x25   : > { %178 = sbr.rel (%p696_p3) target bundleno = 454 (0x1c6), region = 32  ;;  %s180_s6 = sand.u32 (!%p696_p3), 1, %s631_s13  }
  0x26   : > { %s437_s7 = sshll.u32 (!%p696_p3), %s180_s6, 3  ;;  %s181_s10 = scalar_lea.sflag (!%p696_p3), [#allocation3], %s180_s6 }
  0x27   : > { %s184_s11 = scalar_lea.vmem (!%p696_p3), [#allocation2], %s437_s7 }
  0x2a   : > { %618 = dma.done.wait (%p723_p10), %s181_s10, 128  }
  0x2b   : > { %620 = vsyncadd (%p723_p10), %s181_s10, 4294967168 }
  0x2c   : > { %622 = dma.done.wait (%p38_p1), [#allocation5], 6192  }
  0x2d   : > { %624 = vsyncadd (%p38_p1), [#allocation5], 4294961104  ;;  %v227_v0 = vld [vmem:[#allocation4 + $0x28] sm:$0xff]  ;;  %v226_v1 = vld [vmem:[#allocation4 + $0x20] sm:$0xff]  ;;  %vm232_vm0 = vcmask 392192   ;;  %p217_p1 = scmp.lt.s32.totalorder %s691_s19, 1 }
  0x2e   : > { %246 = vmatpush.msra.mxu0 %v227_v0  ;;  %v225_v2 = vld [vmem:[#allocation4 + $0x18] sm:$0xff]  ;;  %v272_v4 = vld [vmem:[#allocation4 + $0xf0] sm:$0xff]  ;;  %v271_v6 = vld [vmem:[#allocation4 + $0xe8] sm:$0xff]  ;;  %vm343_vm1 = vcmask 64512  }
  0x2f   : > { %v273_v3 = vld [vmem:[#allocation4 + $0xf8] sm:$0xff]  ;;  %v224_v5 = vld [vmem:[#allocation4 + $0x10] sm:$0xff]  ;;  %v223_v7 = vld [vmem:[#allocation4 + $0x8] sm:$0xff]  ;;  %s788_s19 = smov (!%p217_p1, %s691_s19), 1 }
  0x30   : > { %247 = vmatpush.msra.mxu0 %v226_v1  ;;  %279 = vmatpush.msra.mxu1 %v273_v3  ;;  %v270_v8 = vld [vmem:[#allocation4 + $0xe0] sm:$0xff]  ;;  %v269_v10 = vld [vmem:[#allocation4 + $0xd8] sm:$0xff]  ;;  %v268_v12 = vld [vmem:[#allocation4 + $0xd0] sm:$0xff]  ;;  %s440_s20 = sshll.u32 %s788_s19, 3 }
  0x31   : > { %v222_v9 = vld [vmem:[#allocation4] sm:$0xff]  ;;  %v221_v11 = vld [vmem:[%s184_s11] sm:$0xff]  ;;  %v267_v13 = vld [vmem:[#allocation4 + $0xc8] sm:$0xff]  ;;  %s220_s17 = scalar_lea.vmem %s779_s3, %s440_s20 }
  0x32   : > { %248 = vmatpush.msra.mxu0 %v225_v2  ;;  %280 = vmatpush.msra.mxu1 %v272_v4  ;;  %v266_v14 = vld [vmem:[#allocation4 + $0xc0] sm:$0xff]  ;;  %v265_v15 = vld [vmem:[#allocation4 + $0xb8] sm:$0xff]  ;;  %v264_v16 = vld [vmem:[#allocation4 + $0xb0] sm:$0xff] }
  0x33   : > { %v263_v17 = vld [vmem:[#allocation4 + $0xa8] sm:$0xff]  ;;  %v262_v18 = vld [vmem:[#allocation4 + $0xa0] sm:$0xff]  ;;  %v261_v19 = vld [vmem:[#allocation4 + $0x98] sm:$0xff] }
  0x34   : > { %249 = vmatpush.msra.mxu0 %v224_v5  ;;  %281 = vmatpush.msra.mxu1 %v271_v6  ;;  %v260_v20 = vld [vmem:[#allocation4 + $0x90] sm:$0xff]  ;;  %v259_v21 = vld [vmem:[#allocation4 + $0x88] sm:$0xff]  ;;  %v258_v22 = vld [vmem:[#allocation4 + $0x80] sm:$0xff] }
  0x35   : > { %v316_v23 = vld [vmem:[#allocation4 + $0x178] sm:$0xff]  ;;  %v315_v24 = vld [vmem:[#allocation4 + $0x170] sm:$0xff]  ;;  %v314_v25 = vld [vmem:[#allocation4 + $0x168] sm:$0xff] }
  0x36   : > { %250 = vmatpush.msra.mxu0 %v223_v7  ;;  %282 = vmatpush.msra.mxu1 %v270_v8  ;;  %v313_v26 = vld [vmem:[#allocation4 + $0x160] sm:$0xff]  ;;  %v312_v27 = vld [vmem:[#allocation4 + $0x158] sm:$0xff]  ;;  %v311_v28 = vld [vmem:[#allocation4 + $0x150] sm:$0xff] }
  0x37   : > { %322 = vmatpush.msra.mxu2 %v316_v23  ;;  %v310_v29 = vld [vmem:[#allocation4 + $0x148] sm:$0xff]  ;;  %v309_v30 = vld [vmem:[#allocation4 + $0x140] sm:$0xff]  ;;  %v308_v31 = vld [vmem:[#allocation4 + $0x138] sm:$0xff] }
  0x38   : > { %251 = vmatpush.msra.mxu0 %v222_v9  ;;  %283 = vmatpush.msra.mxu1 %v269_v10  ;;  %v307_v32 = vld [vmem:[#allocation4 + $0x130] sm:$0xff]  ;;  %v306_v33 = vld [vmem:[#allocation4 + $0x128] sm:$0xff]  ;;  %v305_v34 = vld [vmem:[#allocation4 + $0x120] sm:$0xff] }
  0x39   : > { %441 = vmatmul.msk.f32.vlgmr.msra.gmra.mxu0 %vm232_vm0, %v221_v11  ;;  %323 = vmatpush.msra.mxu2 %v315_v24  ;;  %v304_v35 = vld [vmem:[#allocation4 + $0x118] sm:$0xff]  ;;  %v508_v36 = vld [vmem:[#allocation6] ss:$0 sm:$0xff]  ;;  %v303_v40 = vld [vmem:[#allocation4 + $0x110] sm:$0xff] }
  0x3a   : > { %284 = vmatpush.msra.mxu1 %v268_v12  ;;  %v302_v41 = vld [vmem:[#allocation4 + $0x108] sm:$0xff]  ;;  %v301_v42 = vld [vmem:[#allocation4 + $0x100] sm:$0xff] }
  0x3b   : > { %324 = vmatpush.msra.mxu2 %v314_v25  ;;  %v509_v43 = vld [vmem:[#allocation6 + $0x1] ss:$0 sm:$0xff]  ;;  %v510_v47 = vld [vmem:[#allocation6 + $0x2] ss:$0 sm:$0xff] }
  0x3c   : > { %285 = vmatpush.msra.mxu1 %v267_v13 }
  0x3d   : > { %325 = vmatpush.msra.mxu2 %v313_v26 }
  0x3e   : > { %286 = vmatpush.msra.mxu1 %v266_v14 }
  0x3f   : > { %326 = vmatpush.msra.mxu2 %v312_v27 }
  0x40   : > { %287 = vmatpush.msra.mxu1 %v265_v15 }
  0x41   : > { %327 = vmatpush.msra.mxu2 %v311_v28 }
  0x42   : > { %288 = vmatpush.msra.mxu1 %v264_v16 }
  0x43   : > { %328 = vmatpush.msra.mxu2 %v310_v29 }
  0x44   : > { %289 = vmatpush.msra.mxu1 %v263_v17 }
  0x45   : > { %329 = vmatpush.msra.mxu2 %v309_v30 }
  0x46   : > { %290 = vmatpush.msra.mxu1 %v262_v18 }
  0x47   : > { %330 = vmatpush.msra.mxu2 %v308_v31 }
  0x48   : > { %291 = vmatpush.msra.mxu1 %v261_v19 }
  0x49   : > { %331 = vmatpush.msra.mxu2 %v307_v32 }
  0x4a   : > { %292 = vmatpush.msra.mxu1 %v260_v20 }
  0x4b   : > { %332 = vmatpush.msra.mxu2 %v306_v33 }
  0x4c   : > { %293 = vmatpush.msra.mxu1 %v259_v21 }
  0x4d   : > { %333 = vmatpush.msra.mxu2 %v305_v34 }
  0x4e   : > { %294 = vmatpush.msra.mxu1 %v258_v22 }
  0x4f   : > { %334 = vmatpush.msra.mxu2 %v304_v35 }
  0x51   : > { %335 = vmatpush.msra.mxu2 %v303_v40 }
  0x53   : > { %336 = vmatpush.msra.mxu2 %v302_v41 }
  0x55   : > { %337 = vmatpush.msra.mxu2 %v301_v42 }
  0xb6   : > { %v253_v37 = vpop.f32.mrf.mxu0 }
  0xb7   : > { %v254_v38 = vadd.f32 %v508_v36, %v253_v37 }
  0xb9   : > { %v256_v39 = vmax.f32 %v254_v38, 0.0 }
  0xbb   : > { %295 = vmatmul.f32.vlgmr.msra.gmra.mxu1 %v256_v39 }
 0x138   : > { %v296_v44 = vpop.f32.mrf.mxu1 }
 0x139   : > { %v297_v45 = vadd.f32 %v509_v43, %v296_v44 }
 0x13b   : > { %v299_v46 = vmax.f32 %v297_v45, 0.0 }
 0x13d   : > { %338 = vmatmul.f32.vlgmr.msra.gmra.mxu2 %v299_v46 }
 0x1c0   : > { %v339_v48 = vpop.f32.mrf.mxu2 }
 0x1c1   : > { %v340_v49 = vadd.f32 %v510_v47, %v339_v48 }
 0x1c3   : > { %v342_v50 = vmax.f32 %v340_v49, 0.0 }
 0x1c5   : > { %344 = vst.msk [vmem:[%s220_s17] sm:$0xff] %vm343_vm1, %v342_v50 }
 0x1c6 PF: > { %p14_p3 = scmp.ge.s32.totalorder %s708_s5, 4   ;;  %s783_s12 = smov %s631_s13 }
 0x1c7   : > { %s784_s13 = smov %s635_s14  ;;  %s785_s14 = smov %s719_s8 }
 0x1c8   : > { %s786_s15 = smov %s708_s5  ;;  %16 = sbr.rel (!%p14_p3) target bundleno = 4 (0x4), region = 84 }
 0x1cd   :  { %364 = vsyncpa [#allocation3], 1 }
 0x1ce   :  { %366 = vsyncpa [#allocation3 + $0x1], 1 }
 0x1cf   :  { %367 = vsyncpa [#allocation5], 1 }

</bundles_post_ra>
